<compile_context>
chip_gen: v7x
topology: tpu7x:2x2x1
jax: 0.10.0
libtpu: 0.0.40
codegen_flags: <defaults>
</compile_context>

<pallas_src>
import functools
import math

import jax
import jax.numpy as jnp
from jax.experimental import pallas as pl
from jax.experimental.pallas import tpu as pltpu

# ~2 MiB blocks: 2 streams (x, out) x 2 pipeline buffers = ~8 MiB VMEM,
# comfortably inside the default scoped limit on every generation (incl. v7x).
_TARGET_BLOCK_BYTES = 2 * 1024 * 1024


def _round_up(a, m):
    return ((a + m - 1) // m) * m


def _fused_leaky_relu_kernel(x_ref, b_ref, o_ref, *, negative_slope, scale):
    # x_ref: (tile_r, tile_c); b_ref broadcasts against it ((tile_r,1) or (1,C)).
    x = x_ref[...]
    b = b_ref[...].astype(x.dtype)  # bias kept f32 in HBM; tiny resident block
    xb = x + b
    pos = jnp.asarray(scale, dtype=xb.dtype)
    neg = jnp.asarray(scale * negative_slope, dtype=xb.dtype)
    # Fold the scale into the select: cmp + select + mul (one fewer VPU mul).
    o_ref[...] = (xb * jnp.where(xb >= 0, pos, neg)).astype(o_ref.dtype)


def _choose_tiles_nchw(NC, HW, C, itemsize, target=_TARGET_BLOCK_BYTES):
    """Pick (tile_r, tile_c) for the (N*C, H*W) layout."""
    # Row tile must be a multiple of lcm(C, 8): multiple of C keeps the bias
    # block grid-invariant; multiple of 8 satisfies the sublane constraint.
    unit = (C * 8) // math.gcd(C, 8)
    min_rows = min(unit, NC)

    # Lane (column) tile: full rows if affordable, else a multiple of 128.
    if HW * min_rows * itemsize <= target:
        tile_c = HW
    else:
        tile_c = max(128, (target // (min_rows * itemsize)) // 128 * 128)

    # Sublane (row) tile: as many bias periods as fit in the budget, or all rows.
    rows = max(unit, (target // (tile_c * itemsize)) // unit * unit)
    tile_r = min(rows, NC)

    # Keep >= 2 grid steps for large problems so both v7x TensorCores get work.
    if (NC * HW * itemsize > (512 << 10)
            and pl.cdiv(NC, tile_r) * pl.cdiv(HW, tile_c) < 2
            and NC >= 2 * unit):
        tile_r = _round_up(pl.cdiv(NC, 2), unit)
    return tile_r, tile_c


def _choose_tiles_nhwc(NHW, C, itemsize, target=_TARGET_BLOCK_BYTES):
    """Pick tile_r for the (N*H*W, C) layout (channels on the lane axis)."""
    rows = max(8, (target // (C * itemsize)) // 8 * 8)
    tile_r = NHW if NHW <= rows else rows
    if (NHW * C * itemsize > (512 << 10)
            and pl.cdiv(NHW, tile_r) < 2 and NHW >= 16):
        tile_r = _round_up(pl.cdiv(NHW, 2), 8)
    return tile_r


def fused_leaky_relu(x, bias, negative_slope=0.2, scale=2 ** 0.5):
    """x: (N, C, H, W); bias: (channel,) with channel >= C (matches the
    PyTorch `[:, :x.shape[1]]` slice). Returns (N, C, H, W)."""
    N, C, H, W = x.shape
    HW = H * W
    NC = N * C
    itemsize = jnp.dtype(x.dtype).itemsize
    bias_f32 = bias[:C].astype(jnp.float32)

    kernel = functools.partial(
        _fused_leaky_relu_kernel,
        negative_slope=float(negative_slope),
        scale=float(scale),
    )

    if HW >= 128 or HW >= C:
        # --- NCHW flattening: rows = (n, c), lanes = spatial ---------------
        tile_r, tile_c = _choose_tiles_nchw(NC, HW, C, itemsize)
        x_flat = x.reshape(NC, HW)
        # One bias block shared by every grid step (tile_r % C == 0, so row r
        # of any block is channel r % C). Constant index_map -> DMA'd once.
        b_block = jnp.tile(bias_f32, tile_r // C).reshape(tile_r, 1)
        grid = (pl.cdiv(NC, tile_r), pl.cdiv(HW, tile_c))

        out_flat = pl.pallas_call(
            kernel,
            out_shape=jax.ShapeDtypeStruct((NC, HW), x.dtype),
            grid_spec=pltpu.PrefetchScalarGridSpec(
                num_scalar_prefetch=0,
                grid=grid,
                in_specs=[
                    pl.BlockSpec((tile_r, tile_c), lambda i, j: (i, j)),
                    pl.BlockSpec((tile_r, 1), lambda i, j: (0, 0)),
                ],
                out_specs=pl.BlockSpec((tile_r, tile_c), lambda i, j: (i, j)),
            ),
            compiler_params=pltpu.CompilerParams(
                dimension_semantics=("parallel", "parallel")),
        )(x_flat, b_block)
        return out_flat.reshape(N, C, H, W)

    # --- Small spatial maps (HW < 128 < C): NHWC flattening ----------------
    # Channels on the lane axis -> dense (unmasked) stores instead of vst.msk.
    NHW = N * HW
    tile_r = _choose_tiles_nhwc(NHW, C, itemsize)
    x_flat = x.transpose(0, 2, 3, 1).reshape(NHW, C)
    b_row = bias_f32.reshape(1, C)
    grid = (pl.cdiv(NHW, tile_r),)

    out_flat = pl.pallas_call(
        kernel,
        out_shape=jax.ShapeDtypeStruct((NHW, C), x.dtype),
        grid_spec=pltpu.PrefetchScalarGridSpec(
            num_scalar_prefetch=0,
            grid=grid,
            in_specs=[
                pl.BlockSpec((tile_r, C), lambda i: (i, 0)),
                pl.BlockSpec((1, C), lambda i: (0, 0)),
            ],
            out_specs=pl.BlockSpec((tile_r, C), lambda i: (i, 0)),
        ),
        compiler_params=pltpu.CompilerParams(
            dimension_semantics=("parallel",)),
    )(x_flat, b_row)
    return out_flat.reshape(N, H, W, C).transpose(0, 3, 1, 2)


class FusedLeakyReLU:
    """JAX/Pallas port of the PyTorch FusedLeakyReLU module."""

    def __init__(self, channel, negative_slope=0.2, scale=2 ** 0.5):
        # nn.Parameter(torch.zeros(channel)) -> deterministic zeros init
        self.bias = jnp.zeros((channel,), dtype=jnp.float32)
        self.negative_slope = negative_slope
        self.scale = scale

    def __call__(self, x):
        return fused_leaky_relu(x, self.bias, self.negative_slope, self.scale)


def _reference(x, bias, negative_slope, scale):
    C = x.shape[1]
    xb = x + bias[:C].reshape(1, C, 1, 1)
    return scale * jnp.where(xb >= 0, xb, negative_slope * xb)


if __name__ == "__main__":
    key = jax.random.PRNGKey(0)
    k_x1, k_b1, k_x2, k_b2 = jax.random.split(key, 4)

    # Case 1: lane-dense spatial path (N*C, H*W).
    N, C, H, W = 2, 4, 16, 16
    x1 = jax.random.normal(k_x1, (N, C, H, W), dtype=jnp.float32)
    mod1 = FusedLeakyReLU(channel=C)
    mod1.bias = jax.random.normal(k_b1, (C,), dtype=jnp.float32)
    out1 = jax.block_until_ready(mod1(x1))
    ref1 = _reference(x1, mod1.bias, mod1.negative_slope, mod1.scale)
    assert out1.shape == (N, C, H, W)
    assert jnp.allclose(out1, ref1, atol=1e-5, rtol=1e-5)

    # Case 2: small spatial / many channels path (N*H*W, C).
    N2, C2, H2, W2 = 2, 128, 4, 4
    x2 = jax.random.normal(k_x2, (N2, C2, H2, W2), dtype=jnp.float32)
    mod2 = FusedLeakyReLU(channel=C2)
    mod2.bias = jax.random.normal(k_b2, (C2,), dtype=jnp.float32)
    out2 = jax.block_until_ready(mod2(x2))
    ref2 = _reference(x2, mod2.bias, mod2.negative_slope, mod2.scale)
    assert out2.shape == (N2, C2, H2, W2)
    assert jnp.allclose(out2, ref2, atol=1e-5, rtol=1e-5)

    print("KERNEL_OK")
</pallas_src>

<mosaic_0001>
module attributes {stable_mosaic.version = 11 : i64} {
  func.func @_fused_leaky_relu_kernel(%arg0: i32, %arg1: i32, %arg2: memref<8x256xf32, #tpu.memory_space<vmem>>, %arg3: memref<8x1xf32, #tpu.memory_space<vmem>>, %arg4: memref<8x256xf32, #tpu.memory_space<vmem>>) attributes {dimension_semantics = [#tpu.dimension_semantics<parallel>, #tpu.dimension_semantics<parallel>], iteration_bounds = array<i64: 1, 1>, scalar_prefetch = 0 : i64, scratch_operands = 0 : i64, tpu.core_type = #tpu.core_type<tc>, window_params = [{transform_indices = @transform_0, window_bounds = array<i64: 8, 256>}, {pipeline_mode = #tpu.pipeline_mode<synchronous>, transform_indices = @transform_1, window_bounds = array<i64: 8, 1>}, {transform_indices = @transform_2, window_bounds = array<i64: 8, 256>}]} {
    %c0 = arith.constant 0 : index
    %c0_0 = arith.constant 0 : index
    %0 = vector.load %arg2[%c0, %c0_0] : memref<8x256xf32, #tpu.memory_space<vmem>>, vector<8x256xf32>
    %c0_1 = arith.constant 0 : index
    %c0_2 = arith.constant 0 : index
    %1 = vector.load %arg3[%c0_1, %c0_2] : memref<8x1xf32, #tpu.memory_space<vmem>>, vector<8x1xf32>
    %2 = vector.broadcast %1 : vector<8x1xf32> to vector<8x256xf32>
    %3 = arith.addf %0, %2 : vector<8x256xf32>
    %cst = arith.constant 0.000000e+00 : f32
    %4 = vector.broadcast %cst : f32 to vector<8x256xf32>
    %5 = arith.cmpf oge, %3, %4 : vector<8x256xf32>
    %cst_3 = arith.constant 1.41421354 : f32
    %cst_4 = arith.constant 0.282842726 : f32
    %6 = vector.broadcast %cst_3 : f32 to vector<8x256xf32>
    %7 = vector.broadcast %cst_4 : f32 to vector<8x256xf32>
    %8 = arith.select %5, %6, %7 : vector<8x256xi1>, vector<8x256xf32>
    %9 = arith.mulf %3, %8 : vector<8x256xf32>
    %c0_5 = arith.constant 0 : index
    %c0_6 = arith.constant 0 : index
    %10 = vector.load %arg4[%c0_5, %c0_6] : memref<8x256xf32, #tpu.memory_space<vmem>>, vector<8x256xf32>
    tpu.vector_store %arg4[%c0_5, %c0_6], %9 {strides = array<i32>} : memref<8x256xf32, #tpu.memory_space<vmem>>, vector<8x256xf32>,
    return
  }
  func.func @transform_0(%arg0: i32, %arg1: i32) -> (i32, i32) {
    %c0_i32 = arith.constant 0 : i32
    return %arg0, %arg1 : i32, i32
  }
  func.func @transform_1(%arg0: i32, %arg1: i32) -> (i32, i32) {
    %c0_i32 = arith.constant 0 : i32
    %c0_i32_0 = arith.constant 0 : i32
    %c0_i32_1 = arith.constant 0 : i32
    return %c0_i32, %c0_i32_0 : i32, i32
  }
  func.func @transform_2(%arg0: i32, %arg1: i32) -> (i32, i32) {
    %c0_i32 = arith.constant 0 : i32
    return %arg0, %arg1 : i32, i32
  }
}

</mosaic_0001>

<bundles_post_ra>
// kernel: tpu_custom_call.1
= control target key start
LH: loop header
LB: loop body
LE: loop exit
PB: predicated region body
PF: predicated region fallthrough
CT: control target
= control target key end

     0   :  { %7 = vsyncpa [#allocation3], 0  ;;  %s156_s0 = inlined_call_operand.hbm [shape: f32[8,256], index: 0, kind: input, shape index: {}]   ;;  %s157_s1 = inlined_call_operand.vmem [shape: f32[8,1], index: 1, kind: input, shape index: {}]   ;;  %s158_s2 = inlined_call_operand.hbm [shape: f32[8,256], index: 2, kind: output, shape index: {}]  }
   0x1   :  { %8 = vsyncpa [#allocation4], 0  ;;  %s110_s9 = smov [#allocation2]   ;;  %s62_s13 = scalar_lea.hbm %s156_s0, 256 }
   0x2   :  { %s15_s10 = sshll.u32 %s110_s9, 4  ;;  %p63_p0 = scmp.ne.s32.totalorder %s156_s0, %s62_s13  ;;  %s16_s10 = int_to_ptr.vmem [resolvable:$true] %s15_s10 }
   0x3   :  { %p66_p1 = scmp.lt.u32.totalorder %s62_s13, %s156_s0 }
   0x5   :  { %p68_p2 = pnand %p66_p1, %p63_p0 }
   0x7   :  { %71 = shalt.err (!%p68_p2)
}
   0x8   :  { %s72_s18 = scalar_lea.vmem %s16_s10, 256  ;;  %p77_p4 = scmp.lt.s32.totalorder %s16_s10, %s16_s10 }
   0x9   :  { %p73_p3 = scmp.ne.s32.totalorder %s16_s10, %s72_s18  ;;  %p78_p5 = scmp.lt.s32.totalorder %s72_s18, %s72_s18 }
   0xb   :  { %p79_p6 = por %p78_p5, %p77_p4 }
   0xd   :  { %p80_p7 = pnand %p79_p6, %p73_p3 }
   0xf   :  { %83 = shalt.err (!%p80_p7)
}
  0x10   :  { %18 = dma.hbm_to_vmem [thread:$0]  %s156_s0, 256, %s16_s10, [#allocation3]  }
  0x11   :  { %106 = dma.done.wait [#allocation3], 256  }
  0x12   :  { %107 = vsyncadd [#allocation3], 4294967040  ;;  %v111_v0 = vmov 0   ;;  %v26_v1 = vld [vmem:[%s157_s1] sm:$0xff]  ;;  %v25_v3 = vld [vmem:[#allocation2 + $0x8] sm:$0xff]  ;;  %s112_s23 = smov [#allocation5]  }
  0x13   :  { %61 = vset.pattern.permute.xlu0 %v111_v0  ;;  %v24_v2 = vld [vmem:[#allocation2] sm:$0xff]  ;;  %s48_s24 = sshll.u32 %s112_s23, 4  ;;  %v113_v7 = vmov 0.28284273   ;;  %s49_s24 = int_to_ptr.vmem [resolvable:$true] %s48_s24 }
  0x14   :  { %29 = vperm.xlu0 %61, %v26_v1   ;;  %s84_s0 = scalar_lea.vmem %s49_s24, 256  ;;  %p89_p9 = scmp.lt.s32.totalorder %s49_s24, %s49_s24 }
  0x15   :  { %p85_p8 = scmp.ne.s32.totalorder %s49_s24, %s84_s0  ;;  %p90_p10 = scmp.lt.s32.totalorder %s84_s0, %s84_s0 }
  0x17   :  { %p91_p11 = por %p90_p10, %p89_p9 }
  0x19   :  { %p92_p12 = pnand %p91_p11, %p85_p8 }
  0x93   :  { %v30_v4 = vpop.permute.xlu0 %29 }
  0x94   :  { %v32_v5 = vadd.f32 %v30_v4, %v24_v2  ;;  %v33_v6 = vadd.f32 %v30_v4, %v25_v3 }
  0x96   :  { %vm34_vm0 = vcmp.ge.f32.partialorder %v32_v5, 0.0  ;;  %vm35_vm1 = vcmp.ge.f32.partialorder %v33_v6, 0.0 }
  0x97   :  { %v36_v8 = vsel %vm34_vm0, 1.4142135, %v113_v7  ;;  %v37_v9 = vsel %vm35_vm1, 1.4142135, %v113_v7 }
  0x98   :  { %v38_v10 = vmul.f32 %v36_v8, %v32_v5  ;;  %v39_v11 = vmul.f32 %v37_v9, %v33_v6 }
  0x9a   :  { %40 = vst [vmem:[#allocation5] sm:$0xff] %v38_v10  ;;  %41 = vst [vmem:[#allocation5 + $0x8] sm:$0xff] %v39_v11 }
  0x9b   :  { %95 = shalt.err (!%p92_p12)
}
  0x9c   :  { %s96_s26 = scalar_lea.hbm %s158_s2, 256 }
  0x9d   :  { %p97_p13 = scmp.ne.s32.totalorder %s158_s2, %s96_s26  ;;  %p100_p0 = scmp.lt.u32.totalorder %s96_s26, %s158_s2 }
  0x9f   :  { %p102_p1 = pnand %p100_p0, %p97_p13 }
  0xa1   :  { %105 = shalt.err (!%p102_p1)
}
  0xa2   :  { %51 = dma.vmem_to_hbm [thread:$0]  %s49_s24, 256, %s158_s2, [#allocation4]  }
  0xa3   :  { %108 = dma.done.wait [#allocation4], 256  }
  0xa4   :  { %109 = vsyncadd [#allocation4], 4294967040 }
  0xa5   :  { %55 = vsyncpa [#allocation3], 1 }
  0xa6   :  { %56 = vsyncpa [#allocation4], 1 }

</bundles_post_ra>
